<compile_context>
chip_gen: v6e
topology: v6e:2x2x1
jax: 0.10.0
libtpu: 0.0.40
codegen_flags: <defaults>
</compile_context>

<pallas_src>
import jax
import jax.numpy as jnp
from jax import lax
from jax.experimental import pallas as pl
from jax.experimental.pallas import tpu as pltpu

# ----------------------------- model config ---------------------------------
EMBED_DIM = 32                       # embed_dim
NUM_WORDS = 64                       # num_words
NUM_HEADS = EMBED_DIM // 16          # nhead = embed_dim // 16 = 2
HEAD_DIM = EMBED_DIM // NUM_HEADS    # 16
FFN_DIM = 512                        # dim_feedforward
HEAD_HIDDEN = NUM_WORDS // 2         # 32
NW_PAD = 128                         # lane-dense padded logits width
LN_EPS = 1e-5
BATCH = 2
SEQ = 8
TOKENS = BATCH * SEQ                 # flattened [B*S] token slab

# packing of the 32-row weight slab relies on HEAD_HIDDEN == EMBED_DIM (32)
assert HEAD_HIDDEN == EMBED_DIM

# column offsets inside the packed [E, 800] weight slab (wide slices first so
# they start on 128-lane boundaries)
W1_OFF = 0                                    # [E, FFN]
H2W_OFF = W1_OFF + FFN_DIM                    # [HH, 128] (padded from [HH, NW])
QKV_OFF = H2W_OFF + NW_PAD                    # [E, 3E]  (q | k | v, head-major)
WOUT_OFF = QKV_OFF + 3 * EMBED_DIM            # [E, E]
H1W_OFF = WOUT_OFF + EMBED_DIM                # [E, HH]
WMAT_COLS = H1W_OFF + HEAD_HIDDEN             # 800

# row indices inside the packed [10 + BS, 512] vector slab
(R_QKV_B, R_BOUT, R_N1W, R_N1B, R_N2W, R_N2B, R_B1, R_B2, R_H1B, R_H2B) = range(10)
R_MASK = 10                                   # rows R_MASK .. R_MASK+BS-1
VEC_ROWS = R_MASK + TOKENS
VEC_COLS = FFN_DIM                            # 512


def _layernorm(x, w, b):
    # PyTorch LayerNorm: biased variance, eps=1e-5; x: [N, E], w/b: [1, E]
    mu = jnp.mean(x, axis=-1, keepdims=True)
    xc = x - mu
    var = jnp.mean(xc * xc, axis=-1, keepdims=True)
    return xc * lax.rsqrt(var + LN_EPS) * w + b


def _make_kernel(B, S):
    E, H, D = EMBED_DIM, NUM_HEADS, HEAD_DIM
    HH, FFN = HEAD_HIDDEN, FFN_DIM
    BS = B * S
    scale = 1.0 / float(D) ** 0.5
    bf16 = jnp.bfloat16
    f32 = jnp.float32

    def kernel(x_ref, wmat_ref, w2_ref, vec_ref, o_ref):
        x = x_ref[...]                                     # [BS, E] f32

        # --- static slices of the packed weight slab (bf16) ---
        w1 = wmat_ref[:, W1_OFF:W1_OFF + FFN]              # [E, FFN]
        h2w = wmat_ref[:, H2W_OFF:H2W_OFF + NW_PAD]        # [HH, 128]
        qkvw = wmat_ref[:, QKV_OFF:QKV_OFF + 3 * E]        # [E, 3E]
        wout = wmat_ref[:, WOUT_OFF:WOUT_OFF + E]          # [E, E]
        h1w = wmat_ref[:, H1W_OFF:H1W_OFF + HH]            # [E, HH]

        # --- static slices of the packed vector slab (f32) ---
        qkv_b = vec_ref[R_QKV_B:R_QKV_B + 1, 0:3 * E]
        bout = vec_ref[R_BOUT:R_BOUT + 1, 0:E]
        n1w = vec_ref[R_N1W:R_N1W + 1, 0:E]
        n1b = vec_ref[R_N1B:R_N1B + 1, 0:E]
        n2w = vec_ref[R_N2W:R_N2W + 1, 0:E]
        n2b = vec_ref[R_N2B:R_N2B + 1, 0:E]
        b1 = vec_ref[R_B1:R_B1 + 1, 0:FFN]
        b2 = vec_ref[R_B2:R_B2 + 1, 0:E]
        h1b = vec_ref[R_H1B:R_H1B + 1, 0:HH]
        h2b = vec_ref[R_H2B:R_H2B + 1, 0:NW_PAD]           # padded lanes = -1e30
        mask = vec_ref[R_MASK:R_MASK + BS, 0:BS]           # block-diag 0 / -1e30

        # ---- self-attention: fused QKV across both heads (one MXU push) ----
        qkv = jnp.dot(x.astype(bf16), qkvw,
                      preferred_element_type=f32) + qkv_b  # [BS, 3E] f32

        ctx = []
        for h in range(H):                                 # static loop, H = 2
            q = qkv[:, h * D:(h + 1) * D] * scale
            k = qkv[:, E + h * D:E + (h + 1) * D]
            v = qkv[:, 2 * E + h * D:2 * E + (h + 1) * D]
            # q . k^T contracting last dims (no materialized transpose)
            s = lax.dot_general(q, k, (((1,), (1,)), ((), ())),
                                preferred_element_type=f32) + mask
            s = s - jnp.max(s, axis=-1, keepdims=True)
            p = jnp.exp(s)
            # approx reciprocal rides the EUP slot; fine inside attention
            p = p * pl.reciprocal(jnp.sum(p, axis=-1, keepdims=True), approx=True)
            ctx.append(jnp.dot(p, v, preferred_element_type=f32))
        ctx = jnp.concatenate(ctx, axis=1)                 # [BS, H*D] = [BS, E]

        # single out-projection contraction over the lane-stacked heads
        attn = jnp.dot(ctx.astype(bf16), wout, preferred_element_type=f32) + bout

        # ---- post-norm encoder layer: x = LN1(x + SA(x)); x = LN2(x + FF(x)) ----
        y = _layernorm(x + attn, n1w, n1b)
        f = jnp.dot(y.astype(bf16), w1, preferred_element_type=f32) + b1
        f = jnp.maximum(f, 0.0)                            # ReLU
        f = jnp.dot(f.astype(bf16), w2_ref[...], preferred_element_type=f32) + b2
        z = _layernorm(y + f, n2w, n2b)

        # ---- head: Linear -> ReLU -> Linear -> Softmax (exact, user-visible) ----
        hd = jnp.maximum(
            jnp.dot(z.astype(bf16), h1w, preferred_element_type=f32) + h1b, 0.0)
        logits = jnp.dot(hd.astype(bf16), h2w,
                         preferred_element_type=f32) + h2b  # [BS, 128]
        # padded lanes carry a -1e30 bias -> exp underflows to exactly 0
        logits = logits - jnp.max(logits, axis=-1, keepdims=True)
        e = jnp.exp(logits)
        probs = e / jnp.sum(e, axis=-1, keepdims=True)      # exact division
        o_ref[...] = probs.astype(o_ref.dtype)              # lane-dense store

    return kernel


def error_corrector_forward(x, packed):
    """x: [B, S, E] pre-embedded tokens; packed: dict from init_params."""
    B, S, E = x.shape
    assert (B, S, E) == (BATCH, SEQ, EMBED_DIM)
    BS = B * S
    x2 = x.reshape(BS, E)

    args = (x2, packed["wmat"], packed["w2"], packed["vecs"])

    def full_spec(a):
        return pl.BlockSpec(a.shape, lambda i: (0, 0))     # full-array block

    out = pl.pallas_call(
        _make_kernel(B, S),
        out_shape=jax.ShapeDtypeStruct((BS, NW_PAD), jnp.float32),
        grid_spec=pltpu.PrefetchScalarGridSpec(
            num_scalar_prefetch=0,
            grid=(1,),                                     # whole forward, one step
            in_specs=[full_spec(a) for a in args],
            out_specs=pl.BlockSpec((BS, NW_PAD), lambda i: (0, 0)),
        ),
        compiler_params=pltpu.CompilerParams(
            dimension_semantics=("arbitrary",),
        ),
    )(*args)

    return out[:, :NUM_WORDS].reshape(B, S, NUM_WORDS)


def init_params(key):
    """Deterministic synthetic parameters in PyTorch layout, packed into the
    kernel's DMA slabs (Linear weights transposed to [in, out])."""
    ks = jax.random.split(key, 12)
    s = 0.05
    E, H, D, NW, HH = EMBED_DIM, NUM_HEADS, HEAD_DIM, NUM_WORDS, HEAD_HIDDEN

    def w(k, shape):
        return jax.random.normal(k, shape, jnp.float32) * s

    # ---- torch-layout tensors ----
    w_in = w(ks[0], (3 * E, E))        # MultiheadAttention packed in_proj [3E, E]
    b_in = w(ks[1], (3 * E,))
    wout_t = w(ks[2], (E, E))          # out_proj [E_out, E_in]
    bout_t = w(ks[3], (E,))
    w1_t = w(ks[4], (FFN_DIM, E)); b1_t = w(ks[5], (FFN_DIM,))
    w2_t = w(ks[6], (E, FFN_DIM)); b2_t = w(ks[7], (E,))
    h1w_t = w(ks[8], (HH, E)); h1b_t = w(ks[9], (HH,))
    h2w_t = w(ks[10], (NW, HH)); h2b_t = w(ks[11], (NW,))
    n1w = jnp.ones((E,), jnp.float32); n1b = jnp.zeros((E,), jnp.float32)
    n2w = jnp.ones((E,), jnp.float32); n2b = jnp.zeros((E,), jnp.float32)

    # ---- weight slab [E, 800], bf16 (MXU operands only) ----
    qkv_w = w_in.T                                          # [E, 3E]; head h of q/k/v at cols h*D:(h+1)*D
    wout = wout_t.T                                         # [E, E]
    w1 = w1_t.T                                             # [E, FFN]
    w2 = w2_t.T                                             # [FFN, E]
    h1w = h1w_t.T                                           # [E, HH]
    h2w_pad = jnp.zeros((HH, NW_PAD), jnp.float32).at[:, :NW].set(h2w_t.T)

    wmat = jnp.concatenate([w1, h2w_pad, qkv_w, wout, h1w], axis=1)
    assert wmat.shape == (E, WMAT_COLS)

    # ---- vector slab [10 + BS, 512], f32 ----
    def vrow(vals):
        r = jnp.zeros((1, VEC_COLS), jnp.float32)
        return r.at[0, :vals.shape[0]].set(vals)

    h2b_pad = jnp.full((NW_PAD,), -1e30, jnp.float32).at[:NW].set(h2b_t)

    sent = jnp.arange(TOKENS) // SEQ                        # sentence id per token
    same = sent[:, None] == sent[None, :]
    mask_block = jnp.where(same, 0.0, -1e30).astype(jnp.float32)   # [BS, BS]
    mask_rows = jnp.zeros((TOKENS, VEC_COLS), jnp.float32).at[:, :TOKENS].set(mask_block)

    vecs = jnp.concatenate([
        vrow(b_in),          # R_QKV_B: fused q|k|v bias (96)
        vrow(bout_t),        # R_BOUT
        vrow(n1w), vrow(n1b),
        vrow(n2w), vrow(n2b),
        vrow(b1_t),          # R_B1 (512)
        vrow(b2_t),          # R_B2
        vrow(h1b_t),         # R_H1B
        vrow(h2b_pad),       # R_H2B: padded lanes = -1e30 (zero softmax mass)
        mask_rows,           # R_MASK.. : block-diagonal attention mask
    ], axis=0)
    assert vecs.shape == (VEC_ROWS, VEC_COLS)

    return {
        "wmat": wmat.astype(jnp.bfloat16),
        "w2": w2.astype(jnp.bfloat16),
        "vecs": vecs,
    }


if __name__ == "__main__":
    key = jax.random.PRNGKey(0)
    k_x, k_p = jax.random.split(key)

    # "embedded sentences": [B, S, E]
    x = jax.random.normal(k_x, (BATCH, SEQ, EMBED_DIM), jnp.float32)
    params = init_params(k_p)

    out = error_corrector_forward(x, params)
    out = jax.block_until_ready(out)

    assert out.shape == (BATCH, SEQ, NUM_WORDS)
    assert bool(jnp.all(jnp.isfinite(out)))
    assert bool(jnp.all(out >= 0.0))
    # exact output softmax -> rows sum to 1 within f32 rounding
    row_sums = jnp.sum(out, axis=-1)
    assert bool(jnp.allclose(row_sums, 1.0, atol=1e-5))

    print("KERNEL_OK")
</pallas_src>

<mosaic_0001>
module attributes {stable_mosaic.version = 11 : i64} {
  func.func @kernel(%arg0: i32, %arg1: memref<16x32xf32, #tpu.memory_space<vmem>>, %arg2: memref<32x800xbf16, #tpu.memory_space<vmem>>, %arg3: memref<512x32xbf16, #tpu.memory_space<vmem>>, %arg4: memref<26x512xf32, #tpu.memory_space<vmem>>, %arg5: memref<16x128xf32, #tpu.memory_space<vmem>>) attributes {dimension_semantics = [#tpu.dimension_semantics<arbitrary>], iteration_bounds = array<i64: 1>, scalar_prefetch = 0 : i64, scratch_operands = 0 : i64, tpu.core_type = #tpu.core_type<tc>, window_params = [{pipeline_mode = #tpu.pipeline_mode<synchronous>, transform_indices = @transform_0, window_bounds = array<i64: 16, 32>}, {pipeline_mode = #tpu.pipeline_mode<synchronous>, transform_indices = @transform_1, window_bounds = array<i64: 32, 800>}, {pipeline_mode = #tpu.pipeline_mode<synchronous>, transform_indices = @transform_2, window_bounds = array<i64: 512, 32>}, {pipeline_mode = #tpu.pipeline_mode<synchronous>, transform_indices = @transform_3, window_bounds = array<i64: 26, 512>}, {pipeline_mode = #tpu.pipeline_mode<synchronous>, transform_indices = @transform_4, window_bounds = array<i64: 16, 128>}]} {
    %c0 = arith.constant 0 : index
    %c0_0 = arith.constant 0 : index
    %0 = vector.load %arg1[%c0, %c0_0] : memref<16x32xf32, #tpu.memory_space<vmem>>, vector<16x32xf32>
    %c0_1 = arith.constant 0 : index
    %c0_2 = arith.constant 0 : index
    %1 = vector.load %arg2[%c0_1, %c0_2] : memref<32x800xbf16, #tpu.memory_space<vmem>>, vector<32x512xbf16>
    %c0_3 = arith.constant 0 : index
    %c512 = arith.constant 512 : index
    %2 = vector.load %arg2[%c0_3, %c512] : memref<32x800xbf16, #tpu.memory_space<vmem>>, vector<32x128xbf16>
    %c0_4 = arith.constant 0 : index
    %c640 = arith.constant 640 : index
    %3 = vector.load %arg2[%c0_4, %c640] : memref<32x800xbf16, #tpu.memory_space<vmem>>, vector<32x96xbf16>
    %c0_5 = arith.constant 0 : index
    %c736 = arith.constant 736 : index
    %4 = vector.load %arg2[%c0_5, %c736] : memref<32x800xbf16, #tpu.memory_space<vmem>>, vector<32x32xbf16>
    %c0_6 = arith.constant 0 : index
    %c768 = arith.constant 768 : index
    %5 = vector.load %arg2[%c0_6, %c768] : memref<32x800xbf16, #tpu.memory_space<vmem>>, vector<32x32xbf16>
    %c0_7 = arith.constant 0 : index
    %c0_8 = arith.constant 0 : index
    %6 = vector.load %arg4[%c0_7, %c0_8] : memref<26x512xf32, #tpu.memory_space<vmem>>, vector<1x96xf32>
    %c1 = arith.constant 1 : index
    %c0_9 = arith.constant 0 : index
    %7 = vector.load %arg4[%c1, %c0_9] : memref<26x512xf32, #tpu.memory_space<vmem>>, vector<1x32xf32>
    %c2 = arith.constant 2 : index
    %c0_10 = arith.constant 0 : index
    %8 = vector.load %arg4[%c2, %c0_10] : memref<26x512xf32, #tpu.memory_space<vmem>>, vector<1x32xf32>
    %c3 = arith.constant 3 : index
    %c0_11 = arith.constant 0 : index
    %9 = vector.load %arg4[%c3, %c0_11] : memref<26x512xf32, #tpu.memory_space<vmem>>, vector<1x32xf32>
    %c4 = arith.constant 4 : index
    %c0_12 = arith.constant 0 : index
    %10 = vector.load %arg4[%c4, %c0_12] : memref<26x512xf32, #tpu.memory_space<vmem>>, vector<1x32xf32>
    %c5 = arith.constant 5 : index
    %c0_13 = arith.constant 0 : index
    %11 = vector.load %arg4[%c5, %c0_13] : memref<26x512xf32, #tpu.memory_space<vmem>>, vector<1x32xf32>
    %c6 = arith.constant 6 : index
    %c0_14 = arith.constant 0 : index
    %12 = vector.load %arg4[%c6, %c0_14] : memref<26x512xf32, #tpu.memory_space<vmem>>, vector<1x512xf32>
    %c7 = arith.constant 7 : index
    %c0_15 = arith.constant 0 : index
    %13 = vector.load %arg4[%c7, %c0_15] : memref<26x512xf32, #tpu.memory_space<vmem>>, vector<1x32xf32>
    %c8 = arith.constant 8 : index
    %c0_16 = arith.constant 0 : index
    %14 = vector.load %arg4[%c8, %c0_16] : memref<26x512xf32, #tpu.memory_space<vmem>>, vector<1x32xf32>
    %c9 = arith.constant 9 : index
    %c0_17 = arith.constant 0 : index
    %15 = vector.load %arg4[%c9, %c0_17] : memref<26x512xf32, #tpu.memory_space<vmem>>, vector<1x128xf32>
    %c10 = arith.constant 10 : index
    %c0_18 = arith.constant 0 : index
    %16 = vector.load %arg4[%c10, %c0_18] : memref<26x512xf32, #tpu.memory_space<vmem>>, vector<16x16xf32>
    %17 = arith.truncf %0 : vector<16x32xf32> to vector<16x32xbf16>
    %cst = arith.constant dense<0.000000e+00> : vector<16x96xf32>
    %18 = tpu.matmul %17, %3, %cst {dimension_numbers = #tpu.dot_dimension_numbers<[1], [0], [0], [1], [0, 0, 1, 1], [], []>} : vector<16x32xbf16>, vector<32x96xbf16>, vector<16x96xf32> -> vector<16x96xf32>
    %19 = vector.broadcast %6 : vector<1x96xf32> to vector<16x96xf32>
    %20 = arith.addf %18, %19 : vector<16x96xf32>
    %21 = vector.extract_strided_slice %20 {offsets = [0, 0], sizes = [16, 16], strides = [1, 1]} : vector<16x96xf32> to vector<16x16xf32>
    %cst_19 = arith.constant 2.500000e-01 : f32
    %22 = vector.broadcast %cst_19 : f32 to vector<16x16xf32>
    %23 = arith.mulf %21, %22 : vector<16x16xf32>
    %24 = vector.extract_strided_slice %20 {offsets = [0, 32], sizes = [16, 16], strides = [1, 1]} : vector<16x96xf32> to vector<16x16xf32>
    %25 = vector.extract_strided_slice %20 {offsets = [0, 64], sizes = [16, 16], strides = [1, 1]} : vector<16x96xf32> to vector<16x16xf32>
    %cst_20 = arith.constant dense<0.000000e+00> : vector<16x16xf32>
    %26 = tpu.matmul %23, %24, %cst_20 {dimension_numbers = #tpu.dot_dimension_numbers<[1], [1], [0], [0], [0, 0, 1, 0], [], []>} : vector<16x16xf32>, vector<16x16xf32>, vector<16x16xf32> -> vector<16x16xf32>
    %27 = arith.addf %26, %16 : vector<16x16xf32>
    %cst_21 = arith.constant dense<0xFF800000> : vector<16xf32>
    %28 = vector.multi_reduction <maximumf>, %27, %cst_21 [1] : vector<16x16xf32> to vector<16xf32>
    %29 = vector.shape_cast %28 : vector<16xf32> to vector<16x1xf32>
    %30 = vector.broadcast %29 : vector<16x1xf32> to vector<16x16xf32>
    %31 = arith.subf %27, %30 : vector<16x16xf32>
    %32 = math.exp %31 : vector<16x16xf32>
    %cst_22 = arith.constant dense<0.000000e+00> : vector<16xf32>
    %33 = vector.multi_reduction <add>, %32, %cst_22 [1] : vector<16x16xf32> to vector<16xf32>
    %34 = vector.shape_cast %33 : vector<16xf32> to vector<16x1xf32>
    %35 = tpu.reciprocal %34 {approx = true} : vector<16x1xf32> -> vector<16x1xf32>
    %36 = vector.broadcast %35 : vector<16x1xf32> to vector<16x16xf32>
    %37 = arith.mulf %32, %36 : vector<16x16xf32>
    %cst_23 = arith.constant dense<0.000000e+00> : vector<16x16xf32>
    %38 = tpu.matmul %37, %25, %cst_23 {dimension_numbers = #tpu.dot_dimension_numbers<[1], [0], [0], [1], [0, 0, 1, 1], [], []>} : vector<16x16xf32>, vector<16x16xf32>, vector<16x16xf32> -> vector<16x16xf32>
    %39 = vector.extract_strided_slice %20 {offsets = [0, 16], sizes = [16, 16], strides = [1, 1]} : vector<16x96xf32> to vector<16x16xf32>
    %cst_24 = arith.constant 2.500000e-01 : f32
    %40 = vector.broadcast %cst_24 : f32 to vector<16x16xf32>
    %41 = arith.mulf %39, %40 : vector<16x16xf32>
    %42 = vector.extract_strided_slice %20 {offsets = [0, 48], sizes = [16, 16], strides = [1, 1]} : vector<16x96xf32> to vector<16x16xf32>
    %43 = vector.extract_strided_slice %20 {offsets = [0, 80], sizes = [16, 16], strides = [1, 1]} : vector<16x96xf32> to vector<16x16xf32>
    %cst_25 = arith.constant dense<0.000000e+00> : vector<16x16xf32>
    %44 = tpu.matmul %41, %42, %cst_25 {dimension_numbers = #tpu.dot_dimension_numbers<[1], [1], [0], [0], [0, 0, 1, 0], [], []>} : vector<16x16xf32>, vector<16x16xf32>, vector<16x16xf32> -> vector<16x16xf32>
    %45 = arith.addf %44, %16 : vector<16x16xf32>
    %cst_26 = arith.constant dense<0xFF800000> : vector<16xf32>
    %46 = vector.multi_reduction <maximumf>, %45, %cst_26 [1] : vector<16x16xf32> to vector<16xf32>
    %47 = vector.shape_cast %46 : vector<16xf32> to vector<16x1xf32>
    %48 = vector.broadcast %47 : vector<16x1xf32> to vector<16x16xf32>
    %49 = arith.subf %45, %48 : vector<16x16xf32>
    %50 = math.exp %49 : vector<16x16xf32>
    %cst_27 = arith.constant dense<0.000000e+00> : vector<16xf32>
    %51 = vector.multi_reduction <add>, %50, %cst_27 [1] : vector<16x16xf32> to vector<16xf32>
    %52 = vector.shape_cast %51 : vector<16xf32> to vector<16x1xf32>
    %53 = tpu.reciprocal %52 {approx = true} : vector<16x1xf32> -> vector<16x1xf32>
    %54 = vector.broadcast %53 : vector<16x1xf32> to vector<16x16xf32>
    %55 = arith.mulf %50, %54 : vector<16x16xf32>
    %cst_28 = arith.constant dense<0.000000e+00> : vector<16x16xf32>
    %56 = tpu.matmul %55, %43, %cst_28 {dimension_numbers = #tpu.dot_dimension_numbers<[1], [0], [0], [1], [0, 0, 1, 1], [], []>} : vector<16x16xf32>, vector<16x16xf32>, vector<16x16xf32> -> vector<16x16xf32>
    %57 = tpu.concatenate %38, %56 in 1 : vector<16x16xf32>, vector<16x16xf32> -> vector<16x32xf32>
    %58 = arith.truncf %57 : vector<16x32xf32> to vector<16x32xbf16>
    %cst_29 = arith.constant dense<0.000000e+00> : vector<16x32xf32>
    %59 = tpu.matmul %58, %4, %cst_29 {dimension_numbers = #tpu.dot_dimension_numbers<[1], [0], [0], [1], [0, 0, 1, 1], [], []>} : vector<16x32xbf16>, vector<32x32xbf16>, vector<16x32xf32> -> vector<16x32xf32>
    %60 = vector.broadcast %7 : vector<1x32xf32> to vector<16x32xf32>
    %61 = arith.addf %59, %60 : vector<16x32xf32>
    %62 = arith.addf %0, %61 : vector<16x32xf32>
    %cst_30 = arith.constant dense<0.000000e+00> : vector<16xf32>
    %63 = vector.multi_reduction <add>, %62, %cst_30 [1] : vector<16x32xf32> to vector<16xf32>
    %64 = vector.shape_cast %63 : vector<16xf32> to vector<16x1xf32>
    %cst_31 = arith.constant 3.200000e+01 : f32
    %65 = vector.broadcast %cst_31 : f32 to vector<16x1xf32>
    %66 = arith.divf %64, %65 : vector<16x1xf32>
    %67 = vector.broadcast %66 : vector<16x1xf32> to vector<16x32xf32>
    %68 = arith.subf %62, %67 : vector<16x32xf32>
    %69 = arith.mulf %68, %68 : vector<16x32xf32>
    %cst_32 = arith.constant dense<0.000000e+00> : vector<16xf32>
    %70 = vector.multi_reduction <add>, %69, %cst_32 [1] : vector<16x32xf32> to vector<16xf32>
    %71 = vector.shape_cast %70 : vector<16xf32> to vector<16x1xf32>
    %cst_33 = arith.constant 3.200000e+01 : f32
    %72 = vector.broadcast %cst_33 : f32 to vector<16x1xf32>
    %73 = arith.divf %71, %72 : vector<16x1xf32>
    %cst_34 = arith.constant 9.99999974E-6 : f32
    %74 = vector.broadcast %cst_34 : f32 to vector<16x1xf32>
    %75 = arith.addf %73, %74 : vector<16x1xf32>
    %76 = math.rsqrt %75 : vector<16x1xf32>
    %77 = vector.broadcast %76 : vector<16x1xf32> to vector<16x32xf32>
    %78 = arith.mulf %68, %77 : vector<16x32xf32>
    %79 = vector.broadcast %8 : vector<1x32xf32> to vector<16x32xf32>
    %80 = arith.mulf %78, %79 : vector<16x32xf32>
    %81 = vector.broadcast %9 : vector<1x32xf32> to vector<16x32xf32>
    %82 = arith.addf %80, %81 : vector<16x32xf32>
    %83 = arith.truncf %82 : vector<16x32xf32> to vector<16x32xbf16>
    %cst_35 = arith.constant dense<0.000000e+00> : vector<16x512xf32>
    %84 = tpu.matmul %83, %1, %cst_35 {dimension_numbers = #tpu.dot_dimension_numbers<[1], [0], [0], [1], [0, 0, 1, 1], [], []>} : vector<16x32xbf16>, vector<32x512xbf16>, vector<16x512xf32> -> vector<16x512xf32>
    %85 = vector.broadcast %12 : vector<1x512xf32> to vector<16x512xf32>
    %86 = arith.addf %84, %85 : vector<16x512xf32>
    %cst_36 = arith.constant 0.000000e+00 : f32
    %87 = vector.broadcast %cst_36 : f32 to vector<16x512xf32>
    %88 = arith.maximumf %86, %87 : vector<16x512xf32>
    %89 = arith.truncf %88 : vector<16x512xf32> to vector<16x512xbf16>
    %c0_37 = arith.constant 0 : index
    %c0_38 = arith.constant 0 : index
    %90 = vector.load %arg3[%c0_37, %c0_38] : memref<512x32xbf16, #tpu.memory_space<vmem>>, vector<512x32xbf16>
    %cst_39 = arith.constant dense<0.000000e+00> : vector<16x32xf32>
    %91 = tpu.matmul %89, %90, %cst_39 {dimension_numbers = #tpu.dot_dimension_numbers<[1], [0], [0], [1], [0, 0, 1, 1], [], []>} : vector<16x512xbf16>, vector<512x32xbf16>, vector<16x32xf32> -> vector<16x32xf32>
    %92 = vector.broadcast %13 : vector<1x32xf32> to vector<16x32xf32>
    %93 = arith.addf %91, %92 : vector<16x32xf32>
    %94 = arith.addf %82, %93 : vector<16x32xf32>
    %cst_40 = arith.constant dense<0.000000e+00> : vector<16xf32>
    %95 = vector.multi_reduction <add>, %94, %cst_40 [1] : vector<16x32xf32> to vector<16xf32>
    %96 = vector.shape_cast %95 : vector<16xf32> to vector<16x1xf32>
    %cst_41 = arith.constant 3.200000e+01 : f32
    %97 = vector.broadcast %cst_41 : f32 to vector<16x1xf32>
    %98 = arith.divf %96, %97 : vector<16x1xf32>
    %99 = vector.broadcast %98 : vector<16x1xf32> to vector<16x32xf32>
    %100 = arith.subf %94, %99 : vector<16x32xf32>
    %101 = arith.mulf %100, %100 : vector<16x32xf32>
    %cst_42 = arith.constant dense<0.000000e+00> : vector<16xf32>
    %102 = vector.multi_reduction <add>, %101, %cst_42 [1] : vector<16x32xf32> to vector<16xf32>
    %103 = vector.shape_cast %102 : vector<16xf32> to vector<16x1xf32>
    %cst_43 = arith.constant 3.200000e+01 : f32
    %104 = vector.broadcast %cst_43 : f32 to vector<16x1xf32>
    %105 = arith.divf %103, %104 : vector<16x1xf32>
    %cst_44 = arith.constant 9.99999974E-6 : f32
    %106 = vector.broadcast %cst_44 : f32 to vector<16x1xf32>
    %107 = arith.addf %105, %106 : vector<16x1xf32>
    %108 = math.rsqrt %107 : vector<16x1xf32>
    %109 = vector.broadcast %108 : vector<16x1xf32> to vector<16x32xf32>
    %110 = arith.mulf %100, %109 : vector<16x32xf32>
    %111 = vector.broadcast %10 : vector<1x32xf32> to vector<16x32xf32>
    %112 = arith.mulf %110, %111 : vector<16x32xf32>
    %113 = vector.broadcast %11 : vector<1x32xf32> to vector<16x32xf32>
    %114 = arith.addf %112, %113 : vector<16x32xf32>
    %115 = arith.truncf %114 : vector<16x32xf32> to vector<16x32xbf16>
    %cst_45 = arith.constant dense<0.000000e+00> : vector<16x32xf32>
    %116 = tpu.matmul %115, %5, %cst_45 {dimension_numbers = #tpu.dot_dimension_numbers<[1], [0], [0], [1], [0, 0, 1, 1], [], []>} : vector<16x32xbf16>, vector<32x32xbf16>, vector<16x32xf32> -> vector<16x32xf32>
    %117 = vector.broadcast %14 : vector<1x32xf32> to vector<16x32xf32>
    %118 = arith.addf %116, %117 : vector<16x32xf32>
    %cst_46 = arith.constant 0.000000e+00 : f32
    %119 = vector.broadcast %cst_46 : f32 to vector<16x32xf32>
    %120 = arith.maximumf %118, %119 : vector<16x32xf32>
    %121 = arith.truncf %120 : vector<16x32xf32> to vector<16x32xbf16>
    %cst_47 = arith.constant dense<0.000000e+00> : vector<16x128xf32>
    %122 = tpu.matmul %121, %2, %cst_47 {dimension_numbers = #tpu.dot_dimension_numbers<[1], [0], [0], [1], [0, 0, 1, 1], [], []>} : vector<16x32xbf16>, vector<32x128xbf16>, vector<16x128xf32> -> vector<16x128xf32>
    %123 = vector.broadcast %15 : vector<1x128xf32> to vector<16x128xf32>
    %124 = arith.addf %122, %123 : vector<16x128xf32>
    %cst_48 = arith.constant dense<0xFF800000> : vector<16xf32>
    %125 = vector.multi_reduction <maximumf>, %124, %cst_48 [1] : vector<16x128xf32> to vector<16xf32>
    %126 = vector.shape_cast %125 : vector<16xf32> to vector<16x1xf32>
    %127 = vector.broadcast %126 : vector<16x1xf32> to vector<16x128xf32>
    %128 = arith.subf %124, %127 : vector<16x128xf32>
    %129 = math.exp %128 : vector<16x128xf32>
    %cst_49 = arith.constant dense<0.000000e+00> : vector<16xf32>
    %130 = vector.multi_reduction <add>, %129, %cst_49 [1] : vector<16x128xf32> to vector<16xf32>
    %131 = vector.shape_cast %130 : vector<16xf32> to vector<16x1xf32>
    %132 = vector.broadcast %131 : vector<16x1xf32> to vector<16x128xf32>
    %133 = arith.divf %129, %132 : vector<16x128xf32>
    %c0_50 = arith.constant 0 : index
    %c0_51 = arith.constant 0 : index
    %134 = vector.load %arg5[%c0_50, %c0_51] : memref<16x128xf32, #tpu.memory_space<vmem>>, vector<16x128xf32>
    tpu.vector_store %arg5[%c0_50, %c0_51], %133 {strides = array<i32>} : memref<16x128xf32, #tpu.memory_space<vmem>>, vector<16x128xf32>,
    return
  }
  func.func @transform_0(%arg0: i32) -> (i32, i32) {
    %c0_i32 = arith.constant 0 : i32
    %c0_i32_0 = arith.constant 0 : i32
    %c0_i32_1 = arith.constant 0 : i32
    return %c0_i32, %c0_i32_0 : i32, i32
  }
  func.func @transform_1(%arg0: i32) -> (i32, i32) {
    %c0_i32 = arith.constant 0 : i32
    %c0_i32_0 = arith.constant 0 : i32
    %c0_i32_1 = arith.constant 0 : i32
    return %c0_i32, %c0_i32_0 : i32, i32
  }
  func.func @transform_2(%arg0: i32) -> (i32, i32) {
    %c0_i32 = arith.constant 0 : i32
    %c0_i32_0 = arith.constant 0 : i32
    %c0_i32_1 = arith.constant 0 : i32
    return %c0_i32, %c0_i32_0 : i32, i32
  }
  func.func @transform_3(%arg0: i32) -> (i32, i32) {
    %c0_i32 = arith.constant 0 : i32
    %c0_i32_0 = arith.constant 0 : i32
    %c0_i32_1 = arith.constant 0 : i32
    return %c0_i32, %c0_i32_0 : i32, i32
  }
  func.func @transform_4(%arg0: i32) -> (i32, i32) {
    %c0_i32 = arith.constant 0 : i32
    %c0_i32_0 = arith.constant 0 : i32
    %c0_i32_1 = arith.constant 0 : i32
    return %c0_i32, %c0_i32_0 : i32, i32
  }
}

</mosaic_0001>

<bundles_post_ra>
// kernel: tpu_custom_call.1
= control target key start
LH: loop header
LB: loop body
LE: loop exit
PB: predicated region body
PF: predicated region fallthrough
CT: control target
= control target key end

     0   :  { %v1625_v0 = vmov 0.0   ;;  %vm1626_vm0 = vmmov 0   ;;  %vm68_vm1 = vcmask 261120   ;;  %s1940_s0 = inlined_call_operand.vmem [shape: f32[16,32], index: 0, kind: input, shape index: {}]   ;;  %s1941_s1 = inlined_call_operand.vmem [shape: bf16[32,800], index: 1, kind: input, shape index: {}]   ;;  %s1942_s2 = inlined_call_operand.vmem [shape: bf16[512,32], index: 2, kind: input, shape index: {}]   ;;  %s1943_s3 = inlined_call_operand.vmem [shape: f32[26,512], index: 3, kind: input, shape index: {}]   ;;  %s1944_s4 = inlined_call_operand.hbm [shape: f32[16,128], index: 4, kind: output, shape index: {}]  }
   0x1   :  { %1443 = vmatprep.subr.bf16.mxu0 %v1625_v0  ;;  %v1667_v1 = vld [vmem:[%s1941_s1 + $0x4c] ss:$28 sps:$4 sm:$0xff]   ;;  %1447 = vmatprep.mubr.msk.bf16.mxu0 %vm1626_vm0, %v1625_v0  ;;  %v1674_v2 = vld [vmem:[%s1941_s1 + $0x14] ss:$28 sps:$4 sm:$0xff]   ;;  %v1679_v3 = vld [vmem:[%s1940_s0] sm:$0xff] }
   0x2   :  { %1444 = vmatpush3.bf16.msra.mxu0 %v1667_v1  ;;  %v1685_v4 = vld [vmem:[%s1940_s0 + $0x8] sm:$0xff] }
   0x3   :  { %1445 = vmatprep.subr.bf16.mxu0 %v1625_v0  ;;  %v55_v5 = vpack.c.bf16 %v1685_v4, %v1679_v3 }
   0x6   :  { %1446 = vmatpush3.bf16.msra.mxu0 %v1674_v2 }
   0x9   :  { %1448 = vmatmul.mubr.msk.bf16.vlgmr.msra.gmra.mxu0 %vm68_vm1, %v55_v5 }
   0xa   :  { %9 = vsyncpa [#allocation3], 0  ;;  %v41_v6 = vld [vmem:[%s1943_s3] ss:$0 sm:$0xff]  ;;  %vm132_vm2 = vcmask 130048   ;;  %s1627_s0 = smov 80  }
   0xb   :  { %s1628_s25 = smov 96   ;;  %s1629_s26 = smov 112   ;;  %v53_v21 = vld [vmem:[%s1943_s3 + $0x40] sm:$0xff]  ;;  %vm124_vm3 = vcmask 1045504  }
   0xc   :  { %v54_v22 = vld [vmem:[%s1943_s3 + $0x60] sm:$0x3]  ;;  %v52_v23 = vld [vmem:[%s1943_s3 + $0x20] sm:$0xfc]  ;;  %v126_v24 = vrot.slane %v53_v21, 2  ;;  %s1630_s7 = smov 64  }
   0xd   :  { %v128_v25 = vrot.slane %v54_v22, 2  ;;  %v125_v26 = vrot.slane %v52_v23, 2  ;;  %s1631_s8 = smov 48   ;;  %s1632_s9 = smov 32  }
   0xe   :  { %s1633_s10 = smov 16  }
   0xf   :  { %v129_v27 = vsel %vm124_vm3, %v126_v24, %v128_v25  ;;  %v127_v29 = vsel %vm124_vm3, %v125_v26, %v126_v24 }
  0xc9   :  { %v106_v7 = vpop.f32.mrf.mxu0 }
  0xca   :  { %v1695_v8 = vadd.f32 %v106_v7, %v41_v6 }
  0xcb   :  { %v1449_v9 = vpop.f32.mrf.mxu0 }
  0xcc   :  { %v113_v10 = vmul.f32 0.25, %v1695_v8 }
  0xcd   :  { %v109_v11 = vpop.f32.mrf.mxu0 }
  0xce   :  { %v110_v12 = vadd.f32 %v109_v11, %v41_v6  ;;  %1455 = vmatprep.mubr.msk.f32.mxu1 %vm132_vm2, %v113_v10 }
  0xcf   :  { %v1450_v13 = vpop.f32.mrf.mxu0 }
  0xd0   :  { %333 = vrot.lane.b32.xlu1 %v110_v12, %s1627_s0  ;;  %119 = vrot.lane.b32.xlu0 %v110_v12, %s1628_s25  ;;  %v114_v14 = vmul.f32 0.25, %v110_v12 }
  0xd4   :  { %331 = vrot.lane.b32.xlu1 %v1695_v8, %s1627_s0  ;;  %117 = vrot.lane.b32.xlu0 %v1695_v8, %s1628_s25 }
  0xd8   :  { %327 = vrot.lane.b32.xlu0 %v113_v10, %s1629_s26  ;;  %329 = vrot.lane.b32.xlu1 %v114_v14, %s1629_s26 }
 0x142   :  { %v334_v15 = vpop.permute.xlu1 %333  ;;  %v120_v16 = vpop.permute.xlu0 %119 }
 0x143   :  { %1451 = vmatprep.subr.msk.mxu1 %vm132_vm2, %v120_v16  ;;  %1465 = vmatprep.subr.msk.mxu0 %vm132_vm2, %v334_v15 }
 0x144   :  { %1452 = vmatpush3.xpose.msk.msra.mxu1 %vm132_vm2, %v120_v16  ;;  %1466 = vmatpush3.xpose.msk.msra.mxu0 %vm132_vm2, %v334_v15 }
 0x146   :  { %v332_v17 = vpop.permute.xlu1 %331  ;;  %v118_v18 = vpop.permute.xlu0 %117 }
 0x147   :  { %1453 = vmatprep.subr.msk.mxu1 %vm132_vm2, %v118_v18  ;;  %1467 = vmatprep.subr.msk.mxu0 %vm132_vm2, %v332_v17 }
 0x148   :  { %1454 = vmatpush3.xpose.msk.msra.mxu1 %vm132_vm2, %v118_v18  ;;  %1468 = vmatpush3.xpose.msk.msra.mxu0 %vm132_vm2, %v332_v17 }
 0x149   :  { %1479 = vmatprep.subr.bf16.mxu0 %v1625_v0 }
 0x14a   :  { %v328_v19 = vpop.permute.xlu0 %327  ;;  %v330_v20 = vpop.permute.xlu1 %329 }
 0x14b   :  { %1456 = vmatmul.mubr.msk.f32.vlgmr.msra.gmra.mxu1 %vm132_vm2, %v114_v14  ;;  %1469 = vmatprep.mubr.msk.f32.mxu0 %vm132_vm2, %v328_v19 }
 0x14c   :  { %1470 = vmatmul.mubr.msk.f32.vlgmr.msra.gmra.mxu0 %vm132_vm2, %v330_v20 }
 0x14d   :  { %1483 = vmatprep.mubr.msk.bf16.mxu0 %vm1626_vm0, %v1625_v0 }
 0x20b   :  { %v1457_v28 = vpop.f32.mrf.mxu1 }
 0x20c   :  { %v215_v30 = vadd.f32 %v1457_v28, %v129_v27  ;;  %v1471_v31 = vpop.f32.mrf.mxu0 }
 0x20d   :  { %v209_v32 = vpop.f32.mrf.mxu1  ;;  %v415_v38 = vadd.f32 %v1471_v31, %v129_v27 }
 0x20e   :  { %v210_v33 = vadd.f32 %v209_v32, %v127_v29  ;;  %v409_v34 = vpop.f32.mrf.mxu0  ;;  %v221_v35 = vsel %vm132_vm2, %v215_v30, -inf }
 0x20f   :  { %222 = vmax.xlane.f32.xlu1 %v221_v35  ;;  %v410_v36 = vadd.f32 %v409_v34, %v127_v29  ;;  %v421_v40 = vsel %vm132_vm2, %v415_v38, -inf  ;;  %v42_v29 = vld [vmem:[%s1943_s3 + $0x1] ss:$0 sm:$0xff] }
 0x210   :  { %v218_v37 = vsel %vm132_vm2, %v210_v33, -inf }
 0x211   :  { %219 = vmax.xlane.f32.xlu0 %v218_v37  ;;  %v418_v39 = vsel %vm132_vm2, %v410_v36, -inf }
 0x215   :  { %419 = vmax.xlane.f32.xlu0 %v418_v39 }
 0x219   :  { %422 = vmax.xlane.f32.xlu0 %v421_v40 }
 0x220   :  { %242 = vrot.lane.b32.xlu1 %v110_v12, %s1630_s7 }
 0x224   :  { %442 = vrot.lane.b32.xlu1 %v110_v12, %s1631_s8 }
 0x298   :  { %v223_v41 = vpop.xlane.xlu1 %222 }
 0x299   :  { %v225_v42 = vsub.f32 %v215_v30, %v223_v41 }
 0x29a   :  { %v220_v43 = vpop.xlane.xlu0 %219 }
 0x29b   :  { %v228_v44 = vmul.f32 1.442695, %v225_v42  ;;  %v224_v45 = vsub.f32 %v210_v33, %v220_v43 }
 0x29c   :  { %v243_v46 = vpop.permute.xlu1 %242 }
 0x29d   :  { %1571 = vpow2.f32 %v228_v44  ;;  %v226_v47 = vmul.f32 1.442695, %v224_v45  ;;  %1458 = vmatprep.subr.mxu1 %v243_v46 }
 0x29e   :  { %1459 = vmatpush3.msra.mxu1 %v243_v46  ;;  %v420_v48 = vpop.xlane.xlu0 %419 }
 0x29f   :  { %1573 = vpow2.f32 %v226_v47  ;;  %v424_v49 = vsub.f32 %v410_v36, %v420_v48 }
 0x2a0   :  { %v443_v62 = vpop.permute.xlu1 %442 }
 0x2a1   :  { %v426_v50 = vmul.f32 1.442695, %v424_v49  ;;  %v1528_v49 = vld [vmem:[%s1941_s1 + $0x44] ss:$28 sps:$4 sm:$0xff]  }
 0x2a2   :  { %v423_v51 = vpop.xlane.xlu0 %422 }
 0x2a3   :  { %1575 = vpow2.f32 %v426_v50  ;;  %v425_v52 = vsub.f32 %v415_v38, %v423_v51  ;;  %v1523_v50 = vld [vmem:[%s1941_s1 + $0x38] ss:$28 sps:$4 sm:$0xff]   ;;  %v1526_v51 = vld [vmem:[%s1941_s1 + $0x40] ss:$28 sps:$4 sm:$0xff]  }
 0x2a5   :  { %v428_v53 = vmul.f32 1.442695, %v425_v52  ;;  %v1531_v52 = vld [vmem:[%s1941_s1 + $0x4] ss:$28 sps:$4 sm:$0xff]  }
 0x2a7   :  { %1577 = vpow2.f32 %v428_v53  ;;  %v1534_v53 = vld [vmem:[%s1941_s1 + $0xc] ss:$28 sps:$4 sm:$0xff]  }
 0x2aa   :  { %v1572_v54 = vpop.eup %1571 }
 0x2ab   :  { %v233_v55 = vsel %vm132_vm2, %v1572_v54, 0.0 }
 0x2ac   :  { %v1574_v56 = vpop.eup %1573  ;;  %234 = vadd.xlane.f32.xlu0 %v233_v55  ;;  %v1532_v55 = vld [vmem:[%s1941_s1 + $0x8] ss:$28 sps:$4 sm:$0xff]  }
 0x2ad   :  { %v230_v57 = vsel %vm132_vm2, %v1574_v56, 0.0 }
 0x2ae   :  { %231 = vadd.xlane.f32.xlu1 %v230_v57  ;;  %v1535_v57 = vld [vmem:[%s1942_s2 + $0x78] sm:$0xff]  }
 0x2b0   :  { %v1576_v58 = vpop.eup %1575 }
 0x2b1   :  { %v430_v59 = vsel %vm132_vm2, %v1576_v58, 0.0 }
 0x2b2   :  { %431 = vadd.xlane.f32.xlu1 %v430_v59 }
 0x2b4   :  { %v1578_v60 = vpop.eup %1577 }
 0x2b5   :  { %v433_v61 = vsel %vm132_vm2, %v1578_v60, 0.0 }
 0x2b6   :  { %434 = vadd.xlane.f32.xlu0 %v433_v61 }
 0x2c3   :  { %440 = vrot.lane.b32.xlu1 %v1695_v8, %s1631_s8 }
 0x2cc   :  { %240 = vrot.lane.b32.xlu0 %v1695_v8, %s1630_s7 }
 0x2d0   :  { %540 = vrot.lane.b32.xlu0 %v1667_v1, %s1632_s9 }
 0x2d4   :  { %538 = vrot.lane.b32.xlu0 %v1674_v2, %s1632_s9 }
 0x335   :  { %v235_v63 = vpop.xlane.xlu0 %234 }
 0x336   :  { %1579 = vrcp.f32 %v235_v63 }
 0x337   :  { %v232_v5 = vpop.xlane.xlu1 %231 }
 0x338   :  { %1581 = vrcp.f32 %v232_v5 }
 0x33b   :  { %v432_v6 = vpop.xlane.xlu1 %431 }
 0x33c   :  { %1583 = vrcp.f32 %v432_v6 }
 0x33f   :  { %v435_v7 = vpop.xlane.xlu0 %434  ;;  %v441_v14 = vpop.permute.xlu1 %440 }
 0x340   :  { %1585 = vrcp.f32 %v435_v7 }
 0x343   :  { %v241_v9 = vpop.permute.xlu0 %240  ;;  %v1580_v10 = vpop.eup %1579 }
 0x344   :  { %1460 = vmatprep.subr.mxu1 %v241_v9  ;;  %v239_v13 = vmul.f32 %v1580_v10, %v1572_v54  ;;  %v1529_v54 = vld [vmem:[%s1941_s1] ss:$28 sps:$4 sm:$0xff]  }
 0x345   :  { %v1582_v11 = vpop.eup %1581  ;;  %1461 = vmatpush3.msra.mxu1 %v241_v9  ;;  %v43_v9 = vld [vmem:[%s1943_s3 + $0x2] ss:$0 sm:$0xff] }
 0x346   :  { %1472 = vmatprep.subr.mxu1 %v443_v62  ;;  %v238_v12 = vmul.f32 %v1582_v11, %v1574_v56  ;;  %v1634_v56 = vmov 0  }
 0x347   :  { %v541_v18 = vpop.permute.xlu0 %540 }
 0x348   :  { %1462 = vmatprep.mubr.msk.f32.mxu1 %vm132_vm2, %v238_v12  ;;  %1480 = vmatpush3.bf16.msra.mxu0 %v541_v18 }
 0x349   :  { %v1584_v8 = vpop.eup %1583  ;;  %1463 = vmatmul.mubr.msk.f32.vlgmr.msra.gmra.mxu1 %vm132_vm2, %v239_v13  ;;  %1481 = vmatprep.subr.bf16.mxu0 %v1625_v0  ;;  %v44_v13 = vld [vmem:[%s1943_s3 + $0x3] ss:$0 sm:$0xff] }
 0x34a   :  { %1473 = vmatpush3.msra.mxu1 %v443_v62  ;;  %v438_v15 = vmul.f32 %v1584_v8, %v1576_v58  ;;  %v1536_v58 = vld [vmem:[%s1942_s2 + $0xf8] sm:$0xff]  }
 0x34b   :  { %1474 = vmatprep.subr.mxu1 %v441_v14  ;;  %v539_v20 = vpop.permute.xlu0 %538 }
 0x34c   :  { %1475 = vmatpush3.msra.mxu1 %v441_v14  ;;  %1476 = vmatprep.mubr.msk.f32.mxu1 %vm132_vm2, %v438_v15 }
 0x34d   :  { %v1586_v16 = vpop.eup %1585  ;;  %1482 = vmatpush3.bf16.msra.mxu0 %v539_v20  ;;  %v1540_v20 = vld [vmem:[%s1942_s2 + $0xf0] sm:$0xff]  }
 0x34e   :  { %v439_v17 = vmul.f32 %v1586_v16, %v1578_v60  ;;  %741 = vmatprep.subr.bf16.mxu0 %v1528_v49  ;;  %v1537_v16 = vld [vmem:[%s1942_s2 + $0x38] sm:$0xff]  }
 0x34f   :  { %v1306_v49 = vld [vmem:[%s1943_s3 + $0x6] ss:$8 sm:$0xf] }
 0x350   :  { %1477 = vmatmul.mubr.msk.f32.vlgmr.msra.gmra.mxu1 %vm132_vm2, %v439_v17  ;;  %v1538_v17 = vld [vmem:[%s1942_s2 + $0xb8] sm:$0xff]  }
 0x351   :  { %718 = vmatprep.mubr.bf16.mxu1 %v1634_v56 }
 0x409   :  { %v1464_v19 = vpop.f32.mrf.mxu1 }
 0x40b   :  { %v318_v21 = vpop.f32.mrf.mxu1 }
 0x410   :  { %v1478_v22 = vpop.f32.mrf.mxu1 }
 0x412   :  { %v518_v23 = vpop.f32.mrf.mxu1 }
 0x413   :  { %v1516_v24 = vpack.i.bf16 %v1478_v22, %v518_v23  ;;  %v1542_v22 = vld [vmem:[%s1942_s2 + $0xb0] sm:$0xff]   ;;  %v1543_v23 = vld [vmem:[%s1942_s2 + $0x68] sm:$0xff]  }
 0x415   :  { %1517 = vrot.lane.b32.xlu1 %v1516_v24, %s1633_s10  ;;  %v1544_v24 = vld [vmem:[%s1942_s2 + $0xe8] sm:$0xff]  }
 0x487   :  { %v1518_v25 = vpop.permute.xlu1 %1517 }
 0x488   :  { %v1520_v26 = vunpack.i.h.bf16 %v1518_v25  ;;  %v1519_v27 = vunpack.i.l.bf16 %v1518_v25  ;;  %v1545_v25 = vld [vmem:[%s1942_s2 + $0x28] sm:$0xff]  }
 0x48a   :  { %v536_v1 = vsel %vm132_vm2, %v1464_v19, %v1520_v26  ;;  %v535_v2 = vsel %vm132_vm2, %v318_v21, %v1519_v27  ;;  %v1539_v19 = vld [vmem:[%s1942_s2 + $0x70] sm:$0xff]   ;;  %v1546_v26 = vld [vmem:[%s1942_s2 + $0xa8] sm:$0xff]   ;;  %v1547_v27 = vld [vmem:[%s1942_s2 + $0x60] sm:$0xff]  }
 0x48b   :  { %v537_v28 = vpack.c.bf16 %v536_v1, %v535_v2  ;;  %v1541_v21 = vld [vmem:[%s1942_s2 + $0x30] sm:$0xff]   ;;  %v1548_v1 = vld [vmem:[%s1942_s2 + $0xe0] sm:$0xff]  }
 0x48c   :  { %v1549_v2 = vld [vmem:[%s1942_s2 + $0x20] sm:$0xff]  }
 0x48d   :  { %1484 = vmatmul.mubr.msk.bf16.vlgmr.msra.gmra.mxu0 %vm68_vm1, %v537_v28  ;;  %v1550_v28 = vld [vmem:[%s1942_s2 + $0xa0] sm:$0xff]  }
 0x48e   :  { %742 = vmatpush1.bf16.msra.mxu0 %v1526_v51  ;;  %761 = vmatprep.mubr.bf16.mxu0 %v1634_v56 }
 0x48f   :  { %743 = vmatprep.subr.bf16.mxu0 %v1534_v53 }
 0x492   :  { %744 = vmatpush1.bf16.msra.mxu0 %v1532_v55 }
 0x493   :  { %1415 = vmatprep.subr.bf16.mxu0 %v1536_v58 }
 0x54d   :  { %v581_v30 = vpop.f32.mrf.mxu0 }
 0x54e   :  { %v582_v31 = vadd.f32 %v581_v30, %v42_v29  ;;  %v1552_v30 = vld [vmem:[%s1942_s2 + $0xd8] sm:$0xff]  }
 0x54f   :  { %v1485_v32 = vpop.f32.mrf.mxu0 }
 0x550   :  { %v588_v33 = vadd.f32 %v582_v31, %v1679_v3  ;;  %v1553_v31 = vld [vmem:[%s1942_s2 + $0x18] sm:$0xff]  }
 0x551   :  { %v584_v34 = vpop.f32.mrf.mxu0  ;;  %v1554_v32 = vld [vmem:[%s1942_s2 + $0x98] sm:$0xff]  }
 0x552   :  { %v585_v35 = vadd.f32 %v584_v34, %v42_v29  ;;  %v590_v36 = vsel %vm68_vm1, %v588_v33, 0.0  ;;  %v1551_v29 = vld [vmem:[%s1942_s2 + $0x58] sm:$0xff]   ;;  %v1556_v34 = vld [vmem:[%s1942_s2 + $0xd0] sm:$0xff]  }
 0x553   :  { %591 = vadd.xlane.f32.xlu1 %v590_v36  ;;  %v1486_v37 = vpop.f32.mrf.mxu0  ;;  %v1558_v36 = vld [vmem:[%s1942_s2 + $0x90] sm:$0xff]  }
 0x554   :  { %v589_v38 = vadd.f32 %v585_v35, %v1685_v4  ;;  %v1525_v4 = vld [vmem:[%s1941_s1 + $0x3c] ss:$28 sps:$4 sm:$0xff]   ;;  %v1557_v35 = vld [vmem:[%s1942_s2 + $0x10] sm:$0xff]   ;;  %v1559_v37 = vld [vmem:[%s1942_s2 + $0x48] sm:$0xff]  }
 0x555   :  { %698 = vmatprep.subr.bf16.mxu1 %v1525_v4 }
 0x556   :  { %v593_v39 = vsel %vm68_vm1, %v589_v38, 0.0  ;;  %699 = vmatpush1.bf16.msra.mxu1 %v1523_v50 }
 0x557   :  { %594 = vadd.xlane.f32.xlu0 %v593_v39  ;;  %700 = vmatprep.subr.bf16.mxu1 %v1531_v52  ;;  %v1561_v39 = vld [vmem:[%s1942_s2 + $0x8] sm:$0xff]  }
 0x55a   :  { %701 = vmatpush1.bf16.msra.mxu1 %v1529_v54 }
 0x55b   :  { %1393 = vmatprep.subr.bf16.mxu1 %v1535_v57 }
 0x5dc   :  { %v592_v40 = vpop.xlane.xlu1 %591 }
 0x5dd   :  { %v597_v41 = vmul.f32 0.03125, %v592_v40  ;;  %v1562_v40 = vld [vmem:[%s1942_s2 + $0x88] sm:$0xff]  }
 0x5df   :  { %v599_v42 = vsub.f32 %v588_v33, %v597_v41  ;;  %v1555_v33 = vld [vmem:[%s1942_s2 + $0x50] sm:$0xff]   ;;  %v1563_v41 = vld [vmem:[%s1942_s2 + $0x40] sm:$0xff]  }
 0x5e0   :  { %v595_v43 = vpop.xlane.xlu0 %594 }
 0x5e1   :  { %v598_v44 = vmul.f32 0.03125, %v595_v43  ;;  %v601_v45 = vmul.f32 %v599_v42, %v599_v42  ;;  %v1565_v43 = vld [vmem:[%s1942_s2] sm:$0xff]  }
 0x5e3   :  { %v600_v46 = vsub.f32 %v589_v38, %v598_v44  ;;  %v603_v3 = vsel %vm68_vm1, %v601_v45, 0.0  ;;  %v1560_v38 = vld [vmem:[%s1942_s2 + $0xc8] sm:$0xff]   ;;  %v1566_v44 = vld [vmem:[%s1942_s2 + $0x80] sm:$0xff]   ;;  %v623_v45 = vlaneseq }
 0x5e4   :  { %604 = vadd.xlane.f32.xlu0 %v603_v3 }
 0x5e5   :  { %v602_v47 = vmul.f32 %v600_v46, %v600_v46 }
 0x5e7   :  { %v606_v48 = vsel %vm68_vm1, %v602_v47, 0.0 }
 0x5e8   :  { %607 = vadd.xlane.f32.xlu1 %v606_v48 }
 0x66d   :  { %v605_v59 = vpop.xlane.xlu0 %604 }
 0x66e   :  { %v609_v60 = vmul.f32 0.03125, %v605_v59 }
 0x670   :  { %v611_v61 = vadd.f32 1e-05, %v609_v60 }
 0x671   :  { %v608_v62 = vpop.xlane.xlu1 %607 }
 0x672   :  { %1587 = vrsqrt.f32 %v611_v61  ;;  %v610_v63 = vmul.f32 0.03125, %v608_v62 }
 0x674   :  { %v612_v5 = vadd.f32 1e-05, %v610_v63 }
 0x676   :  { %1589 = vrsqrt.f32 %v612_v5 }
 0x67f   :  { %v1588_v6 = vpop.eup %1587 }
 0x680   :  { %v615_v7 = vmul.f32 %v1588_v6, %v599_v42  ;;  %v1564_v42 = vld [vmem:[%s1942_s2 + $0xc0] sm:$0xff]  }
 0x682   :  { %v617_v12 = vmul.f32 %v615_v7, %v43_v9 }
 0x683   :  { %v1590_v10 = vpop.eup %1589 }
 0x684   :  { %v616_v11 = vmul.f32 %v1590_v10, %v600_v46  ;;  %v1793_v14 = vadd.f32 %v617_v12, %v44_v13  ;;  %v624_v46 = vshrl.u32 %v623_v45, 7 }
 0x686   :  { %v618_v8 = vmul.f32 %v616_v11, %v43_v9  ;;  %v629_v3 = vsub.s32 1, %v624_v46  ;;  %v637_v47 = vsub.s32 3, %v624_v46  ;;  %v625_v48 = vsub.s32 0, %v624_v46 }
 0x687   :  { %v633_v4 = vsub.s32 2, %v624_v46 }
 0x688   :  { %v1795_v15 = vadd.f32 %v618_v8, %v44_v13  ;;  %v630_v52 = vrot.slane %v1306_v49, %v629_v3  ;;  %v638_v53 = vrot.slane %v1306_v49, %v637_v47  ;;  %v626_v54 = vrot.slane %v1306_v49, %v625_v48 }
 0x689   :  { %v634_v55 = vrot.slane %v1306_v49, %v633_v4 }
 0x68a   :  { %v621_v18 = vpack.c.bf16 %v1795_v15, %v1793_v14 }
 0x68c   :  { %1331 = vmatmul.mubr.msk.bf16.vlgmr.msra.gmra.mxu1 %vm68_vm1, %v621_v18  ;;  %1332 = vmatmul.mubr.msk.bf16.vlgmr.msra.gmra.mxu0 %vm68_vm1, %v621_v18 }
 0x68d   :  { %1394 = vmatpush3.bf16.msra.mxu1 %v1537_v16  ;;  %1416 = vmatpush3.bf16.msra.mxu0 %v1538_v17 }
 0x68e   :  { %1395 = vmatprep.subr.bf16.mxu1 %v1539_v19  ;;  %1417 = vmatprep.subr.bf16.mxu0 %v1540_v20 }
 0x691   :  { %1396 = vmatpush3.bf16.msra.mxu1 %v1541_v21  ;;  %1418 = vmatpush3.bf16.msra.mxu0 %v1542_v22 }
 0x692   :  { %1397 = vmatprep.subr.bf16.mxu1 %v1543_v23  ;;  %1419 = vmatprep.subr.bf16.mxu0 %v1544_v24 }
 0x695   :  { %1398 = vmatpush3.bf16.msra.mxu1 %v1545_v25  ;;  %1420 = vmatpush3.bf16.msra.mxu0 %v1546_v26 }
 0x696   :  { %1399 = vmatprep.subr.bf16.mxu1 %v1547_v27  ;;  %1421 = vmatprep.subr.bf16.mxu0 %v1548_v1  ;;  %v49_v27 = vld [vmem:[%s1943_s3 + $0x7] ss:$0 sm:$0xff] }
 0x699   :  { %1400 = vmatpush3.bf16.msra.mxu1 %v1549_v2  ;;  %1422 = vmatpush3.bf16.msra.mxu0 %v1550_v28 }
 0x69a   :  { %1401 = vmatprep.subr.bf16.mxu1 %v1551_v29  ;;  %1423 = vmatprep.subr.bf16.mxu0 %v1552_v30 }
 0x69d   :  { %1402 = vmatpush3.bf16.msra.mxu1 %v1553_v31  ;;  %1424 = vmatpush3.bf16.msra.mxu0 %v1554_v32 }
 0x69e   :  { %1403 = vmatprep.subr.bf16.mxu1 %v1555_v33  ;;  %1425 = vmatprep.subr.bf16.mxu0 %v1556_v34 }
 0x6a1   :  { %1404 = vmatpush3.bf16.msra.mxu1 %v1557_v35  ;;  %1426 = vmatpush3.bf16.msra.mxu0 %v1558_v36 }
 0x6a2   :  { %1405 = vmatprep.subr.bf16.mxu1 %v1559_v37  ;;  %1427 = vmatprep.subr.bf16.mxu0 %v1560_v38 }
 0x6a5   :  { %1406 = vmatpush3.bf16.msra.mxu1 %v1561_v39  ;;  %1428 = vmatpush3.bf16.msra.mxu0 %v1562_v40 }
 0x6a6   :  { %1407 = vmatprep.subr.bf16.mxu1 %v1563_v41  ;;  %1429 = vmatprep.subr.bf16.mxu0 %v1564_v42 }
 0x6a9   :  { %1408 = vmatpush3.bf16.msra.mxu1 %v1565_v43  ;;  %1430 = vmatpush3.bf16.msra.mxu0 %v1566_v44 }
 0x6aa   :  { %1487 = vmatprep.subr.bf16.mxu1 %v1625_v0  ;;  %1495 = vmatprep.subr.bf16.mxu0 %v1625_v0 }
 0x74c   :  { %v720_v50 = vpop.f32.mrf.mxu1  ;;  %v763_v51 = vpop.f32.mrf.mxu0 }
 0x74d   :  { %v721_v5 = vadd.f32 %v720_v50, %v626_v54  ;;  %v764_v6 = vadd.f32 %v763_v51, %v634_v55  ;;  %v1568_v51 = vld [vmem:[%s1941_s1 + $0x18] ss:$28 sps:$4 sm:$0xff]  }
 0x74e   :  { %v722_v56 = vpop.f32.mrf.mxu1  ;;  %v765_v57 = vpop.f32.mrf.mxu0 }
 0x74f   :  { %v723_v60 = vadd.f32 %v722_v56, %v630_v52  ;;  %v766_v61 = vadd.f32 %v765_v57, %v638_v53  ;;  %v772_v19 = vmax.f32 %v721_v5, 0.0  ;;  %v774_v20 = vmax.f32 %v764_v6, 0.0  ;;  %v46_v5 = vld [vmem:[%s1943_s3 + $0x5] ss:$0 sm:$0xff] }
 0x750   :  { %v724_v58 = vpop.f32.mrf.mxu1  ;;  %v767_v59 = vpop.f32.mrf.mxu0 }
 0x751   :  { %v725_v62 = vadd.f32 %v724_v58, %v626_v54  ;;  %v768_v63 = vadd.f32 %v767_v59, %v634_v55  ;;  %v773_v8 = vmax.f32 %v723_v60, 0.0  ;;  %v775_v16 = vmax.f32 %v766_v61, 0.0  ;;  %v45_v60 = vld [vmem:[%s1943_s3 + $0x4] ss:$0 sm:$0xff] }
 0x752   :  { %v726_v7 = vpop.f32.mrf.mxu1  ;;  %v769_v9 = vpop.f32.mrf.mxu0 }
 0x753   :  { %v727_v10 = vadd.f32 %v726_v7, %v630_v52  ;;  %v770_v11 = vadd.f32 %v769_v9, %v638_v53  ;;  %v776_v12 = vmax.f32 %v725_v62, 0.0  ;;  %v778_v13 = vmax.f32 %v768_v63, 0.0 }
 0x755   :  { %v777_v17 = vmax.f32 %v727_v10, 0.0  ;;  %v779_v18 = vmax.f32 %v770_v11, 0.0  ;;  %v780_v23 = vpack.c.bf16 %v776_v12, %v772_v19  ;;  %v782_v24 = vpack.c.bf16 %v778_v13, %v774_v20  ;;  %v1569_v11 = vld [vmem:[%s1941_s1 + $0x48] ss:$28 sps:$4 sm:$0xff]   ;;  %v1570_v12 = vld [vmem:[%s1941_s1 + $0x10] ss:$28 sps:$4 sm:$0xff]  }
 0x756   :  { %v50_v13 = vld [vmem:[%s1943_s3 + $0x20] ss:$0 sm:$0xff] }
 0x757   :  { %v781_v21 = vpack.c.bf16 %v777_v17, %v773_v8  ;;  %v783_v22 = vpack.c.bf16 %v779_v18, %v775_v16 }
 0x759   :  { %1072 = vmatprep.mubr.bf16.mxu1 %v781_v21  ;;  %1113 = vmatprep.mubr.bf16.mxu0 %v783_v22 }
 0x75a   :  { %1073 = vmatmul.mubr.bf16.vlgmr.msra.gmra.mxu1 %v780_v23  ;;  %1114 = vmatmul.mubr.bf16.vlgmr.msra.gmra.mxu0 %v782_v24 }
 0x75b   :  { %1491 = vmatprep.mubr.msk.bf16.mxu1 %vm1626_vm0, %v1625_v0  ;;  %1499 = vmatprep.mubr.msk.bf16.mxu0 %vm1626_vm0, %v1625_v0 }
 0x75c   :  { %1496 = vmatpush3.bf16.msra.mxu0 %v1569_v11 }
 0x75d   :  { %1497 = vmatprep.subr.bf16.mxu0 %v1625_v0 }
 0x760   :  { %1498 = vmatpush3.bf16.msra.mxu0 %v1570_v12 }
 0x81a   :  { %v1409_v25 = vpop.f32.mrf.mxu1  ;;  %v1431_v26 = vpop.f32.mrf.mxu0 }
 0x81c   :  { %v1410_v1 = vpop.f32.mrf.mxu1  ;;  %v1432_v2 = vpop.f32.mrf.mxu0 }
 0x81d   :  { %v1411_v28 = vadd.f32 %v1410_v1, %v1409_v25  ;;  %v1433_v32 = vadd.f32 %v1432_v2, %v1431_v26 }
 0x81e   :  { %v1412_v29 = vpop.f32.mrf.mxu1  ;;  %v1434_v30 = vpop.f32.mrf.mxu0 }
 0x81f   :  { %v1075_v31 = vadd.f32 %v1411_v28, %v49_v27 }
 0x820   :  { %v1413_v33 = vpop.f32.mrf.mxu1  ;;  %v1435_v34 = vpop.f32.mrf.mxu0 }
 0x821   :  { %v1116_v35 = vadd.f32 %v1433_v32, %v1075_v31  ;;  %v1414_v36 = vadd.f32 %v1413_v33, %v1412_v29  ;;  %v1436_v38 = vadd.f32 %v1435_v34, %v1434_v30 }
 0x823   :  { %v1078_v37 = vadd.f32 %v1414_v36, %v49_v27  ;;  %v1122_v39 = vadd.f32 %v1116_v35, %v1793_v14 }
 0x825   :  { %v1119_v40 = vadd.f32 %v1436_v38, %v1078_v37  ;;  %v1124_v41 = vsel %vm68_vm1, %v1122_v39, 0.0 }
 0x826   :  { %1125 = vadd.xlane.f32.xlu0 %v1124_v41 }
 0x827   :  { %v1123_v42 = vadd.f32 %v1119_v40, %v1795_v15  ;;  %v1567_v15 = vld [vmem:[%s1941_s1 + $0x50] ss:$28 sps:$4 sm:$0xff]   ;;  %s1635_s1 = smov [#allocation2]  }
 0x828   :  { %1488 = vmatpush3.bf16.msra.mxu1 %v1567_v15 }
 0x829   :  { %v1127_v43 = vsel %vm68_vm1, %v1123_v42, 0.0  ;;  %1489 = vmatprep.subr.bf16.mxu1 %v1625_v0  ;;  %v51_v0 = vld [vmem:[%s1943_s3 + $0x21] ss:$0 sm:$0xff]  ;;  %s1295_s3 = sshll.u32 %s1635_s1, 4  ;;  %s1296_s3 = int_to_ptr.vmem [resolvable:$true] %s1295_s3 }
 0x82a   :  { %1128 = vadd.xlane.f32.xlu1 %v1127_v43  ;;  %s1603_s8 = scalar_lea.vmem %s1296_s3, 256  ;;  %p1608_p1 = scmp.lt.s32.totalorder %s1296_s3, %s1296_s3 }
 0x82b   :  { %p1604_p0 = scmp.ne.s32.totalorder %s1296_s3, %s1603_s8  ;;  %p1609_p2 = scmp.lt.s32.totalorder %s1603_s8, %s1603_s8 }
 0x82c   :  { %1490 = vmatpush3.bf16.msra.mxu1 %v1568_v51 }
 0x82d   :  { %p1610_p3 = por %p1609_p2, %p1608_p1 }
 0x82f   :  { %p1611_p4 = pnand %p1610_p3, %p1604_p0 }
 0x8af   :  { %v1126_v44 = vpop.xlane.xlu0 %1125 }
 0x8b0   :  { %v1130_v45 = vmul.f32 0.03125, %v1126_v44 }
 0x8b2   :  { %v1132_v46 = vsub.f32 %v1122_v39, %v1130_v45 }
 0x8b3   :  { %v1129_v3 = vpop.xlane.xlu1 %1128 }
 0x8b4   :  { %v1131_v47 = vmul.f32 0.03125, %v1129_v3  ;;  %v1134_v48 = vmul.f32 %v1132_v46, %v1132_v46 }
 0x8b6   :  { %v1133_v4 = vsub.f32 %v1123_v42, %v1131_v47  ;;  %v1136_v49 = vsel %vm68_vm1, %v1134_v48, 0.0 }
 0x8b7   :  { %1137 = vadd.xlane.f32.xlu0 %v1136_v49 }
 0x8b8   :  { %v1135_v14 = vmul.f32 %v1133_v4, %v1133_v4 }
 0x8ba   :  { %v1139_v50 = vsel %vm68_vm1, %v1135_v14, 0.0 }
 0x8bb   :  { %1140 = vadd.xlane.f32.xlu1 %v1139_v50 }
 0x940   :  { %v1138_v52 = vpop.xlane.xlu0 %1137 }
 0x941   :  { %v1142_v53 = vmul.f32 0.03125, %v1138_v52 }
 0x943   :  { %v1144_v54 = vadd.f32 1e-05, %v1142_v53 }
 0x944   :  { %v1141_v55 = vpop.xlane.xlu1 %1140 }
 0x945   :  { %1591 = vrsqrt.f32 %v1144_v54  ;;  %v1143_v56 = vmul.f32 0.03125, %v1141_v55 }
 0x947   :  { %v1145_v57 = vadd.f32 1e-05, %v1143_v56 }
 0x949   :  { %1593 = vrsqrt.f32 %v1145_v57 }
 0x952   :  { %v1592_v58 = vpop.eup %1591 }
 0x953   :  { %v1148_v59 = vmul.f32 %v1592_v58, %v1132_v46 }
 0x955   :  { %v1150_v63 = vmul.f32 %v1148_v59, %v45_v60 }
 0x956   :  { %v1594_v61 = vpop.eup %1593 }
 0x957   :  { %v1149_v62 = vmul.f32 %v1594_v61, %v1133_v4  ;;  %v1152_v7 = vadd.f32 %v1150_v63, %v46_v5 }
 0x959   :  { %v1151_v6 = vmul.f32 %v1149_v62, %v45_v60 }
 0x95b   :  { %v1153_v9 = vadd.f32 %v1151_v6, %v46_v5 }
 0x95d   :  { %v1154_v10 = vpack.c.bf16 %v1153_v9, %v1152_v7 }
 0x95f   :  { %1492 = vmatmul.mubr.msk.bf16.vlgmr.msra.gmra.mxu1 %vm68_vm1, %v1154_v10 }
 0xa1f   :  { %v1204_v8 = vpop.f32.mrf.mxu1 }
 0xa20   :  { %v1205_v17 = vadd.f32 %v1204_v8, %v50_v13 }
 0xa21   :  { %v1493_v16 = vpop.f32.mrf.mxu1 }
 0xa22   :  { %v1211_v21 = vmax.f32 %v1205_v17, 0.0 }
 0xa23   :  { %v1207_v18 = vpop.f32.mrf.mxu1 }
 0xa24   :  { %v1208_v19 = vadd.f32 %v1207_v18, %v50_v13 }
 0xa25   :  { %v1494_v20 = vpop.f32.mrf.mxu1 }
 0xa26   :  { %v1212_v22 = vmax.f32 %v1208_v19, 0.0 }
 0xa28   :  { %v1213_v23 = vpack.c.bf16 %v1212_v22, %v1211_v21 }
 0xa2a   :  { %1500 = vmatmul.mubr.msk.bf16.vlgmr.msra.gmra.mxu0 %vm68_vm1, %v1213_v23 }
 0xaea   :  { %v1263_v24 = vpop.f32.mrf.mxu0 }
 0xaeb   :  { %v1264_v25 = vadd.f32 %v1263_v24, %v51_v0 }
 0xaec   :  { %v1501_v26 = vpop.f32.mrf.mxu0 }
 0xaed   :  { %1270 = vmax.xlane.f32.xlu0 %v1264_v25 }
 0xaee   :  { %v1266_v27 = vpop.f32.mrf.mxu0 }
 0xaef   :  { %v1267_v1 = vadd.f32 %v1266_v27, %v51_v0 }
 0xaf0   :  { %v1502_v2 = vpop.f32.mrf.mxu0 }
 0xaf1   :  { %1272 = vmax.xlane.f32.xlu1 %v1267_v1 }
 0xb76   :  { %v1271_v28 = vpop.xlane.xlu0 %1270 }
 0xb77   :  { %v1274_v29 = vsub.f32 %v1264_v25, %v1271_v28 }
 0xb79   :  { %v1276_v30 = vmul.f32 1.442695, %v1274_v29 }
 0xb7a   :  { %v1273_v31 = vpop.xlane.xlu1 %1272 }
 0xb7b   :  { %1595 = vpow2.f32 %v1276_v30  ;;  %v1275_v32 = vsub.f32 %v1267_v1, %v1273_v31 }
 0xb7d   :  { %v1278_v33 = vmul.f32 1.442695, %v1275_v32 }
 0xb7f   :  { %1597 = vpow2.f32 %v1278_v33 }
 0xb88   :  { %v1596_v34 = vpop.eup %1595 }
 0xb89   :  { %1280 = vadd.xlane.f32.xlu0 %v1596_v34 }
 0xb8c   :  { %v1598_v35 = vpop.eup %1597 }
 0xb8d   :  { %1282 = vadd.xlane.f32.xlu1 %v1598_v35 }
 0xc12   :  { %v1281_v36 = vpop.xlane.xlu0 %1280 }
 0xc13   :  { %1599 = vrcp.f32 %v1281_v36 }
 0xc16   :  { %v1283_v37 = vpop.xlane.xlu1 %1282 }
 0xc17   :  { %1601 = vrcp.f32 %v1283_v37 }
 0xc20   :  { %v1600_v38 = vpop.eup %1599 }
 0xc21   :  { %v1285_v39 = vmul.f32 %v1600_v38, %v1596_v34 }
 0xc23   :  { %1288 = vst [vmem:[#allocation2] sm:$0xff] %v1285_v39 }
 0xc24   :  { %v1602_v40 = vpop.eup %1601 }
 0xc25   :  { %v1287_v41 = vmul.f32 %v1602_v40, %v1598_v35 }
 0xc27   :  { %1289 = vst [vmem:[#allocation2 + $0x8] sm:$0xff] %v1287_v41 }
 0xc28   :  { %1614 = shalt.err (!%p1611_p4)
}
 0xc29   :  { %s1636_s9 = smov 128   ;;  %s1637_s10 = smov 8  }
 0xc2a   :  { %1301 = dma.vmem_to_hbm [thread:$0]  %s1296_s3, 256, %s1944_s4, [#allocation3], %s1636_s9, %s1636_s9, %s1637_s10  }
 0xc2b   :  { %1623 = dma.done.wait [#allocation3], 256  }
 0xc2c   :  { %1624 = vsyncadd [#allocation3], 4294967040 }
 0xc2d   :  { %1305 = vsyncpa [#allocation3], 1 }

</bundles_post_ra>
